<compile_context>
chip_gen: v7x
topology: tpu7x:2x2x1
jax: 0.10.0
libtpu: 0.0.40
codegen_flags: <defaults>
</compile_context>

<pallas_src>
import math

import jax
import jax.numpy as jnp
from jax.experimental import pallas as pl
from jax.experimental.pallas import tpu as pltpu

HEADS = 4


def _v_proj_kernel(x1_ref, p1_ref, wv_ref, wpos1_ref, o_ref):
    # Blocks (channels-first):
    #   x1_ref : (1, C, TILE_N)   p1_ref   : (1, 3, TILE_N)
    #   wv_ref : (C, C)           wpos1_ref: (C, 3)
    #   o_ref  : (1, C, TILE_N)
    x1 = x1_ref[0]                                            # (C, TILE_N)
    p1 = p1_ref[0]                                            # (3, TILE_N)

    # v = v_conv(x1) + pos1(p1); attention == 1.0 exactly (softmax over a
    # size-1 axis), so this IS the module's forward output in 'B (H D) N'.
    v = jnp.dot(wv_ref[...], x1, preferred_element_type=jnp.float32)

    # 3-channel position projection as three rank-1 (outer-product) updates on
    # the VPU: avoids the HBM padding pass and a degenerate K=3 MXU matmul.
    w = wpos1_ref[...].astype(jnp.float32)                    # (C, 3)
    for c in range(3):
        v = v + w[:, c:c + 1] * p1[c:c + 1, :].astype(jnp.float32)

    o_ref[0] = v.astype(o_ref.dtype)


def _pick_tile_n(n_pad, c, itemsize):
    """Largest lane-dense N tile under a VMEM budget that is safe on every
    generation (v5e 16 MiB scoped default, v6e/v7x 32 MiB default)."""
    # Per lane-column bytes, double-buffered: x1 block (C rows) + out block
    # (C rows) + p1 block (3 rows -> 8 sublanes in VMEM layout).
    per_col = (2 * c + 8) * max(itemsize, 4)
    budget = 12 * 1024 * 1024                     # double-buffered footprint cap
    t = (budget // (2 * per_col)) // 128 * 128
    return int(max(128, min(n_pad, t, 8192)))


def slef_attention_mutil(x, x1, p, p1, wq, wk, wv, wpos, wpos1, heads=HEADS):
    """Forward pass of slefAttentionMutil.

    x, x1 : (B, C, N); p, p1 : (B, 3, N).
    wq/wk/wv : (C, C) and wpos/wpos1 : (C, 3) in PyTorch conv-weight layout
    (C_out, C_in).  Returns (B, C, N) == 'B (H D) N'.
    """
    B, C, N = x1.shape
    assert C % heads == 0
    # Softmax over the size-1 axis is identically 1.0, so q/k/pos never reach
    # the output; only v = wv@x1 + wpos1@p1 matters.
    # (If q.k overflowed to inf/NaN PyTorch would emit NaN; we return v.)
    del x, p, wq, wk, wpos

    out_dtype = x1.dtype

    # Pad N to a multiple of 128 (lane-dense stores, bounded block sizes).
    n_pad = ((N + 127) // 128) * 128
    if n_pad != N:
        pad = n_pad - N
        x1p = jnp.pad(x1, ((0, 0), (0, 0), (0, pad)))
        p1p = jnp.pad(p1, ((0, 0), (0, 0), (0, pad)))
    else:
        x1p, p1p = x1, p1

    tile_n = _pick_tile_n(n_pad, C, jnp.dtype(x1.dtype).itemsize)
    n_tiles = pl.cdiv(n_pad, tile_n)
    # Keep >= 2 grid steps when possible so v7x's two TensorCores both work.
    if B * n_tiles < 2 and n_pad > 128:
        tile_n = max(128, ((n_pad // 2 + 127) // 128) * 128)
        n_tiles = pl.cdiv(n_pad, tile_n)

    out = pl.pallas_call(
        _v_proj_kernel,
        out_shape=jax.ShapeDtypeStruct((B, C, n_pad), out_dtype),
        grid_spec=pltpu.PrefetchScalarGridSpec(
            num_scalar_prefetch=0,
            grid=(B, n_tiles),
            in_specs=[
                pl.BlockSpec((1, C, tile_n), lambda b, j: (b, 0, j)),
                pl.BlockSpec((1, 3, tile_n), lambda b, j: (b, 0, j)),
                pl.BlockSpec((C, C), lambda b, j: (0, 0)),
                pl.BlockSpec((C, 3), lambda b, j: (0, 0)),
            ],
            out_specs=pl.BlockSpec((1, C, tile_n), lambda b, j: (b, 0, j)),
        ),
        compiler_params=pltpu.CompilerParams(
            dimension_semantics=("parallel", "parallel")),
    )(x1p, p1p, wv, wpos1)

    return out if n_pad == N else out[:, :, :N]


def _reference(x, x1, p, p1, wq, wk, wv, wpos, wpos1, heads=HEADS):
    """Pure-JAX mirror of the full PyTorch forward (q/k/softmax chain kept)."""
    B, C, N = x.shape
    D = C // heads
    pos = jnp.einsum('oi,bin->bon', wpos, p)
    pos1 = jnp.einsum('oi,bin->bon', wpos1, p1)
    q = jnp.einsum('oi,bin->bon', wq, x) + pos
    k = jnp.einsum('oi,bin->bon', wk, x1) + pos1
    v = jnp.einsum('oi,bin->bon', wv, x1) + pos1

    def split(t):  # (B, C, N) -> (B, H, N, 1, D)
        return jnp.transpose(t.reshape(B, heads, D, N), (0, 1, 3, 2))[:, :, :, None, :]

    qh, kh, vh = split(q), split(k), split(v)
    energy = jnp.einsum('bhnkd,bhnjd->bhnkj', qh, kh) / math.sqrt(D)
    attn = jax.nn.softmax(energy, axis=-1)
    out = jnp.einsum('bhnkj,bhnjd->bhnkd', attn, vh)         # (B, H, N, 1, D)
    return jnp.transpose(out[:, :, :, 0, :], (0, 1, 3, 2)).reshape(B, C, N)


if __name__ == "__main__":
    key = jax.random.PRNGKey(0)
    B, C, N = 2, 32, 16  # in_channels=32 -> 4 heads of dim 8; 16 points

    ks = jax.random.split(key, 9)
    x = jax.random.normal(ks[0], (B, C, N), jnp.float32)
    x1 = jax.random.normal(ks[1], (B, C, N), jnp.float32)
    p = jax.random.normal(ks[2], (B, 3, N), jnp.float32)
    p1 = jax.random.normal(ks[3], (B, 3, N), jnp.float32)

    # PyTorch-layout 1x1-conv weights: (C_out, C_in) and (C_out, 3).
    w_scale = 1.0 / math.sqrt(C)
    wq = jax.random.normal(ks[4], (C, C), jnp.float32) * w_scale
    wk = jax.random.normal(ks[5], (C, C), jnp.float32) * w_scale
    wv = jax.random.normal(ks[6], (C, C), jnp.float32) * w_scale
    wpos = jax.random.normal(ks[7], (C, 3), jnp.float32) / math.sqrt(3.0)
    wpos1 = jax.random.normal(ks[8], (C, 3), jnp.float32) / math.sqrt(3.0)

    out = jax.block_until_ready(
        slef_attention_mutil(x, x1, p, p1, wq, wk, wv, wpos, wpos1))
    ref = _reference(x, x1, p, p1, wq, wk, wv, wpos, wpos1)

    assert out.shape == (B, C, N)
    err = float(jnp.max(jnp.abs(out - ref)))
    assert jnp.allclose(out, ref, atol=1e-4, rtol=1e-4), err
    print("KERNEL_OK")
</pallas_src>

<mosaic_0001>
module attributes {stable_mosaic.version = 11 : i64} {
  func.func @_v_proj_kernel(%arg0: i32, %arg1: i32, %arg2: memref<1x32x128xf32, #tpu.memory_space<vmem>>, %arg3: memref<1x3x128xf32, #tpu.memory_space<vmem>>, %arg4: memref<32x32xf32, #tpu.memory_space<vmem>>, %arg5: memref<32x3xf32, #tpu.memory_space<vmem>>, %arg6: memref<1x32x128xf32, #tpu.memory_space<vmem>>) attributes {dimension_semantics = [#tpu.dimension_semantics<parallel>, #tpu.dimension_semantics<parallel>], iteration_bounds = array<i64: 2, 1>, scalar_prefetch = 0 : i64, scratch_operands = 0 : i64, tpu.core_type = #tpu.core_type<tc>, window_params = [{transform_indices = @transform_0, window_bounds = array<i64: 1, 32, 128>}, {transform_indices = @transform_1, window_bounds = array<i64: 1, 3, 128>}, {pipeline_mode = #tpu.pipeline_mode<synchronous>, transform_indices = @transform_2, window_bounds = array<i64: 32, 32>}, {pipeline_mode = #tpu.pipeline_mode<synchronous>, transform_indices = @transform_3, window_bounds = array<i64: 32, 3>}, {transform_indices = @transform_4, window_bounds = array<i64: 1, 32, 128>}]} {
    %c0 = arith.constant 0 : index
    %c0_0 = arith.constant 0 : index
    %c0_1 = arith.constant 0 : index
    %0 = vector.load %arg2[%c0, %c0_0, %c0_1] : memref<1x32x128xf32, #tpu.memory_space<vmem>>, vector<1x32x128xf32>
    %1 = vector.shape_cast %0 : vector<1x32x128xf32> to vector<32x128xf32>
    %c0_2 = arith.constant 0 : index
    %c0_3 = arith.constant 0 : index
    %c0_4 = arith.constant 0 : index
    %2 = vector.load %arg3[%c0_2, %c0_3, %c0_4] : memref<1x3x128xf32, #tpu.memory_space<vmem>>, vector<1x3x128xf32>
    %3 = vector.shape_cast %2 : vector<1x3x128xf32> to vector<3x128xf32>
    %c0_5 = arith.constant 0 : index
    %c0_6 = arith.constant 0 : index
    %4 = vector.load %arg4[%c0_5, %c0_6] : memref<32x32xf32, #tpu.memory_space<vmem>>, vector<32x32xf32>
    %cst = arith.constant dense<0.000000e+00> : vector<32x128xf32>
    %5 = tpu.matmul %4, %1, %cst {dimension_numbers = #tpu.dot_dimension_numbers<[1], [0], [0], [1], [0, 0, 1, 1], [], []>} : vector<32x32xf32>, vector<32x128xf32>, vector<32x128xf32> -> vector<32x128xf32>
    %c0_7 = arith.constant 0 : index
    %c0_8 = arith.constant 0 : index
    %6 = vector.load %arg5[%c0_7, %c0_8] : memref<32x3xf32, #tpu.memory_space<vmem>>, vector<32x3xf32>
    %7 = vector.extract_strided_slice %6 {offsets = [0, 0], sizes = [32, 1], strides = [1, 1]} : vector<32x3xf32> to vector<32x1xf32>
    %8 = vector.extract_strided_slice %3 {offsets = [0, 0], sizes = [1, 128], strides = [1, 1]} : vector<3x128xf32> to vector<1x128xf32>
    %9 = vector.broadcast %7 : vector<32x1xf32> to vector<32x128xf32>
    %10 = vector.broadcast %8 : vector<1x128xf32> to vector<32x128xf32>
    %11 = arith.mulf %9, %10 : vector<32x128xf32>
    %12 = arith.addf %5, %11 : vector<32x128xf32>
    %13 = vector.extract_strided_slice %6 {offsets = [0, 1], sizes = [32, 1], strides = [1, 1]} : vector<32x3xf32> to vector<32x1xf32>
    %14 = vector.extract_strided_slice %3 {offsets = [1, 0], sizes = [1, 128], strides = [1, 1]} : vector<3x128xf32> to vector<1x128xf32>
    %15 = vector.broadcast %13 : vector<32x1xf32> to vector<32x128xf32>
    %16 = vector.broadcast %14 : vector<1x128xf32> to vector<32x128xf32>
    %17 = arith.mulf %15, %16 : vector<32x128xf32>
    %18 = arith.addf %12, %17 : vector<32x128xf32>
    %19 = vector.extract_strided_slice %6 {offsets = [0, 2], sizes = [32, 1], strides = [1, 1]} : vector<32x3xf32> to vector<32x1xf32>
    %20 = vector.extract_strided_slice %3 {offsets = [2, 0], sizes = [1, 128], strides = [1, 1]} : vector<3x128xf32> to vector<1x128xf32>
    %21 = vector.broadcast %19 : vector<32x1xf32> to vector<32x128xf32>
    %22 = vector.broadcast %20 : vector<1x128xf32> to vector<32x128xf32>
    %23 = arith.mulf %21, %22 : vector<32x128xf32>
    %24 = arith.addf %18, %23 : vector<32x128xf32>
    %c0_9 = arith.constant 0 : index
    %c0_10 = arith.constant 0 : index
    %c0_11 = arith.constant 0 : index
    %25 = vector.load %arg6[%c0_9, %c0_10, %c0_11] : memref<1x32x128xf32, #tpu.memory_space<vmem>>, vector<1x32x128xf32>
    %26 = vector.shape_cast %25 : vector<1x32x128xf32> to vector<32x128xf32>
    %27 = vector.shape_cast %24 : vector<32x128xf32> to vector<1x32x128xf32>
    tpu.vector_store %arg6[%c0_9, %c0_10, %c0_11], %27 {strides = array<i32>} : memref<1x32x128xf32, #tpu.memory_space<vmem>>, vector<1x32x128xf32>,
    return
  }
  func.func @transform_0(%arg0: i32, %arg1: i32) -> (i32, i32, i32) {
    %c0_i32 = arith.constant 0 : i32
    %c0_i32_0 = arith.constant 0 : i32
    return %arg0, %c0_i32, %arg1 : i32, i32, i32
  }
  func.func @transform_1(%arg0: i32, %arg1: i32) -> (i32, i32, i32) {
    %c0_i32 = arith.constant 0 : i32
    %c0_i32_0 = arith.constant 0 : i32
    return %arg0, %c0_i32, %arg1 : i32, i32, i32
  }
  func.func @transform_2(%arg0: i32, %arg1: i32) -> (i32, i32) {
    %c0_i32 = arith.constant 0 : i32
    %c0_i32_0 = arith.constant 0 : i32
    %c0_i32_1 = arith.constant 0 : i32
    return %c0_i32, %c0_i32_0 : i32, i32
  }
  func.func @transform_3(%arg0: i32, %arg1: i32) -> (i32, i32) {
    %c0_i32 = arith.constant 0 : i32
    %c0_i32_0 = arith.constant 0 : i32
    %c0_i32_1 = arith.constant 0 : i32
    return %c0_i32, %c0_i32_0 : i32, i32
  }
  func.func @transform_4(%arg0: i32, %arg1: i32) -> (i32, i32, i32) {
    %c0_i32 = arith.constant 0 : i32
    %c0_i32_0 = arith.constant 0 : i32
    return %arg0, %c0_i32, %arg1 : i32, i32, i32
  }
}

</mosaic_0001>

<bundles_post_ra>
// kernel: tpu_custom_call.1
= control target key start
LH: loop header
LB: loop body
LE: loop exit
PB: predicated region body
PF: predicated region fallthrough
CT: control target
= control target key end

     0   :  { %9 = vsyncpa [#allocation3], 0  ;;  %s1066_s0 = inlined_call_operand.hbm [shape: f32[2,32,128], index: 0, kind: input, shape index: {}]   ;;  %s1067_s1 = inlined_call_operand.vmem [shape: f32[2,3,128], index: 1, kind: input, shape index: {}]   ;;  %s1068_s2 = inlined_call_operand.vmem [shape: f32[32,32], index: 2, kind: input, shape index: {}]   ;;  %s1069_s3 = inlined_call_operand.vmem [shape: f32[32,3], index: 3, kind: input, shape index: {}]   ;;  %s1070_s4 = inlined_call_operand.hbm [shape: f32[2,32,128], index: 4, kind: output, shape index: {}]  }
   0x1   :  { %11 = vsyncpa [#allocation3 + $0x1], 0 }
   0x2   :  { %12 = vsyncpa [#allocation4], 0 }
   0x3   :  { %14 = vsyncpa [#allocation4 + $0x1], 0  ;;  %s854_s15 = smov 0   ;;  %s856_s16 = smov 0  }
   0x4   :  { %s858_s17 = smov 0   ;;  %s860_s18 = smov 0  }
   0x5   :  { %s862_s19 = smov 0   ;;  %s864_s20 = smov 0  }
   0x6 LB: > { %s575_s21 = sadd.s32 4294967295, %s818_s20   ;;  %s576_s22 = sadd.s32 4294967294, %s818_s20   ;;  %s818_s20 = sphi %s864_s20, %s20_s20   ;;  %s814_s19 = sphi %s862_s19, %s1085_s19   ;;  %s810_s18 = sphi %s860_s18, %s1084_s18   ;;  %s806_s17 = sphi %s858_s17, %s1083_s17   ;;  %s802_s16 = sphi %s856_s16, %s1082_s16   ;;  %s798_s15 = sphi %s854_s15, %s1081_s15  }
   0x7   : > { %s32_s23 = sadd.s32 1, %s814_s19  ;;  %s41_s24 = sadd.s32 1, %s806_s17 }
   0x8   : > { %p34_p0 = scmp.ge.s32.totalorder %s32_s23, 2  ;;  %p48_p1 = scmp.ne.s32.totalorder %s806_s17, %s802_s16 }
   0x9   : > { %p49_p2 = scmp.eq.s32.totalorder %s818_s20, 0  ;;  %p54_p3 = scmp.ne.s32.totalorder %s802_s16, %s798_s15 }
   0xa   : > { %s1087_s23 = smov (%p34_p0, %s32_s23), 0  ;;  %p55_p5 = scmp.eq.s32.totalorder %s575_s21, 0 }
   0xb   : > { %p895_p4 = por %p49_p2, %p48_p1  ;;  %s36_s26 = ssub.s32 %s814_s19, %s1087_s23 }
   0xc   : > { %p150_p6 = scmp.eq.s32.totalorder %s575_s21, 1  ;;  %p39_p7 = scmp.eq.s32.totalorder %s36_s26, 0 }
   0xd   : > { %p901_p8 = por %p55_p5, %p54_p3  ;;  %p156_p10 = scmp.eq.s32.totalorder %s576_s22, 1 }
   0xe   : > { %p905_p9 = por %p150_p6, %p48_p1  ;;  %p643_p13 = scmp.lt.s32.totalorder %s818_s20, 2 }
   0xf   : > { %s910_s29 = scalar_select %p39_p7, %s806_s17, %s41_s24  }
  0x10   : > { %s1074_s28 = scalar_select %p905_p9, 1, 0 }
  0x11   : > { %p912_p11 = por %p156_p10, %p54_p3  ;;  %s182_s5 = sand.u32 1, %s806_s17  }
  0x12   : > { %s579_s6 = sshll.u32 %s182_s5, 5  ;;  %s595_s7 = sshll.u32 %s814_s19, 9 }
  0x13   : > { %s1075_s30 = scalar_select %p912_p11, 1, 0 }
  0x14   : > { %s923_s10 = scalar_lea.hbm %s1066_s0, %s595_s7  ;;  %s186_s11 = scalar_lea.vmem [#allocation2], %s579_s6 }
  0x15   : > { %s194_s12 = sshll.u32 %s186_s11, 4  ;;  %p929_p0 = pnand %p643_p13, %p895_p4  ;;  %s925_s12 = int_to_ptr.vmem [resolvable:$true] %s194_s12 }
  0x16   : > { %s934_s14 = scalar_lea.sflag [#allocation3], %s182_s5  ;;  %s706_s21 = scalar_lea.hbm %s923_s10, 512 }
  0x17   : > { %p707_p2 = scmp.ne.s32.totalorder %s923_s10, %s706_s21  ;;  %p708_p3 = pneg %p929_p0 }
  0x18   : > { %s711_s25 = scalar_lea.hbm %s1066_s0, 1024  ;;  %p712_p4 = scmp.lt.u32.totalorder %s923_s10, %s1066_s0 }
  0x19   : > { %p709_p5 = pnand %p708_p3, %p707_p2  ;;  %p713_p7 = scmp.lt.u32.totalorder %s711_s25, %s706_s21 }
  0x1a   : > { %p715_p13 = scmp.lt.u32.totalorder %s706_s21, %s923_s10 }
  0x1b   : > { %p710_p6 = pneg %p709_p5  ;;  %p714_p10 = por %p713_p7, %p712_p4 }
  0x1d   : > { %p716_p12 = por %p715_p13, %p714_p10 }
  0x1f   : > { %p717_p1 = pnand %p716_p12, %p710_p6 }
  0x21   : > { %720 = shalt.err (!%p717_p1)
}
  0x22   : > { %s721_s5 = scalar_lea.vmem %s925_s12, 512  ;;  %s820_s7 = smov [#allocation2]  }
  0x23   : > { %p722_p2 = scmp.ne.s32.totalorder %s925_s12, %s721_s5  ;;  %s726_s8 = sshll.u32 %s820_s7, 4  ;;  %s727_s8 = int_to_ptr.vmem [resolvable:$false] %s726_s8 }
  0x24   : > { %s728_s9 = scalar_lea.vmem %s727_s8, 1024  ;;  %p729_p9 = scmp.lt.s32.totalorder %s925_s12, %s727_s8 }
  0x25   : > { %p724_p5 = pnand %p722_p2, %p708_p3  ;;  %p730_p4 = scmp.lt.s32.totalorder %s728_s9, %s721_s5 }
  0x27   : > { %p725_p11 = pneg %p724_p5  ;;  %p731_p7 = por %p730_p4, %p729_p9 }
  0x29   : > { %p732_p10 = pnand %p731_p7, %p725_p11 }
  0x2b   : > { %735 = shalt.err (!%p732_p10)
}
  0x2c   : > { %s821_s11 = smov 128   ;;  %s822_s21 = smov 8  }
  0x2d   : > { %638 = dma.hbm_to_vmem [thread:$0]  (!%p929_p0), %s923_s10, 512, %s925_s12, %s934_s14, %s821_s11, %s821_s11, %s822_s21  }
  0x2e   : > { %p212_p12 = scmp.lt.s32.totalorder %s818_s20, 3  ;;  %p1077_p1 = scmp.ge.s32.totalorder %s818_s20, 1 }
  0x30   : > { %p213_p3 = pnand %p1077_p1, %p212_p12 }
  0x31   : > { %s966_s22 = sand.u32 (!%p213_p3), 1, %s802_s16  }
  0x32   : > { %216 = sbr.rel (%p213_p3) target bundleno = 304 (0x130), region = 36  ;;  %s583_s24 = sshll.u32 (!%p213_p3), %s966_s22, 5 }
  0x33   : > { %s219_s25 = scalar_lea.sflag (!%p213_p3), [#allocation3], %s966_s22  ;;  %s222_s26 = scalar_lea.vmem (!%p213_p3), [#allocation2], %s583_s24 }
  0x39   : > { %789 = dma.done.wait (%p901_p8), %s219_s25, 512  }
  0x3a   : > { %791 = vsyncadd (%p901_p8), %s219_s25, 4294966784  ;;  %v823_v0 = vmov 0   ;;  %vm302_vm0 = vcmask 261120   ;;  %v261_v1 = vld [vmem:[%s222_s26] sm:$0xff]  ;;  %v262_v2 = vld [vmem:[%s222_s26 + $0x8] sm:$0xff]  ;;  %v824_v15 = vmov 1   ;;  %v294_v23 = vlaneseq }
  0x3b   : > { %701 = vset.pattern.permute.xlu1 %v823_v0  ;;  %700 = vset.pattern.permute.xlu0 %v823_v0  ;;  %v263_v3 = vld [vmem:[%s222_s26 + $0x10] sm:$0xff]  ;;  %v619_v4 = vpack.c.bf16 %v262_v2, %v261_v1  ;;  %v264_v5 = vld [vmem:[%s222_s26 + $0x18] sm:$0xff]  ;;  %v266_v6 = vld [vmem:[%s1068_s2] sm:$0xff]  ;;  %v825_v16 = vmov 2   ;;  %p254_p8 = scmp.lt.s32.totalorder %s810_s18, 1  ;;  %s253_s7 = scalar_lea.vmem [#allocation5], %s583_s24 }
  0x3c   : > { %v268_v7 = vld [vmem:[%s1068_s2 + $0x10] sm:$0xff]  ;;  %v623_v8 = vpack.c.bf16 %v264_v5, %v263_v3  ;;  %613 = vmatprep.mubr.msk.f32.mxu0 %vm302_vm0, %v266_v6  ;;  %v270_v10 = vld [vmem:[%s1069_s3] sm:$0xff]  ;;  %v273_v11 = vld [vmem:[%s1069_s3 + $0x18] sm:$0xff]  ;;  %v295_v24 = vshrl.u32 %v294_v23, 7  ;;  %s475_s8 = sshll.u32 %s253_s7, 4  ;;  %s596_s9 = sshll.u32 %s810_s18, 9  ;;  %s1012_s8 = int_to_ptr.vmem [resolvable:$true] %s475_s8 }
  0x3d   : > { %616 = vmatprep.mubr.msk.f32.mxu1 %vm302_vm0, %v268_v7  ;;  %620 = vmatprep.subr.bf16.mxu0 %v619_v4  ;;  %v272_v9 = vld [vmem:[%s1069_s3 + $0x10] sm:$0xff]  ;;  %v267_v12 = vld [vmem:[%s1068_s2 + $0x8] sm:$0xff]  ;;  %v269_v13 = vld [vmem:[%s1068_s2 + $0x18] sm:$0xff]  ;;  %s255_s13 = scalar_select %p254_p8, %s810_s18, 1 }
  0x3e   : > { %627 = vmatprep.subr.bf16.mxu1 %v619_v4  ;;  %622 = vmatpush3.bf16.msra.mxu0 %v619_v4  ;;  %v271_v14 = vld [vmem:[%s1069_s3 + $0x8] sm:$0xff]  ;;  %v296_v27 = vsub.s32 0, %v295_v24  ;;  %v418_v29 = vsub.s32 1, %v295_v24  ;;  %v446_v33 = vsub.s32 2, %v295_v24  ;;  %s1017_s21 = scalar_lea.hbm %s1070_s4, %s596_s9  ;;  %s461_s18 = scalar_lea.sflag [#allocation4], %s966_s22 }
  0x3f   : > { %629 = vmatpush3.bf16.msra.mxu1 %v619_v4  ;;  %624 = vmatprep.subr.bf16.mxu0 %v623_v8  ;;  %s585_s14 = sshll.u32 %s255_s13, 2  ;;  %s736_s25 = scalar_lea.vmem %s1012_s8, 512 }
  0x40   : > { %628 = vmatprep.subr.bf16.mxu1 %v623_v8  ;;  %286 = vperm.xlu1 %701, %v272_v9   ;;  %s260_s5 = scalar_lea.vmem %s1067_s1, %s585_s14  ;;  %p737_p9 = scmp.ne.s32.totalorder %s1012_s8, %s736_s25 }
  0x41   : > { %276 = vperm.xlu0 %700, %v270_v10   ;;  %v265_v28 = vld [vmem:[%s260_s5] sm:$0x7]  ;;  %p1078_p11 = scmp.ne.s32.totalorder %s1074_s28, 0  ;;  %s826_s26 = smov [#allocation5]  }
  0x42   : > { %626 = vmatpush3.bf16.msra.mxu0 %v623_v8  ;;  %v297_v32 = vrot.slane %v265_v28, %v296_v27  ;;  %v419_v34 = vrot.slane %v265_v28, %v418_v29  ;;  %v447_v38 = vrot.slane %v265_v28, %v446_v33  ;;  %s740_s10 = sshll.u32 %s826_s26, 4  ;;  %s741_s10 = int_to_ptr.vmem [resolvable:$false] %s740_s10 }
  0x43   : > { %630 = vmatpush3.bf16.msra.mxu1 %v623_v8  ;;  %p738_p0 = pnand %p737_p9, %p1078_p11  ;;  %s742_s12 = scalar_lea.vmem %s741_s10, 1024 }
  0x44   : > { %291 = vperm.xlu1 %701, %v273_v11   ;;  %p743_p13 = scmp.lt.s32.totalorder %s1012_s8, %s741_s10  ;;  %p744_p2 = scmp.lt.s32.totalorder %s742_s12, %s736_s25 }
  0x45   : > { %281 = vperm.xlu0 %700, %v271_v14   ;;  %614 = vmatmul.mubr.msk.f32.vlgmr.msra.gmra.mrb[0].mxu0 %vm302_vm0, %v267_v12  ;;  %p739_p6 = pneg %p738_p0 }
  0x46   : > { %617 = vmatmul.mubr.msk.f32.vlgmr.msra.gmra.mrb[0].mxu1 %vm302_vm0, %v269_v13  ;;  %p745_p5 = por %p744_p2, %p743_p13 }
  0x48   : > { %703 = vset.pattern.permute.xlu1 %v824_v15  ;;  %p746_p4 = pnand %p745_p5, %p739_p6 }
  0x49   : > { %702 = vset.pattern.permute.xlu0 %v824_v15  ;;  %405 = vperm.xlu1 %703, %v271_v14  }
  0x4a   : > { %401 = vperm.xlu0 %702, %v270_v10  }
  0x4d   : > { %409 = vperm.xlu1 %703, %v272_v9  }
  0x4e   : > { %413 = vperm.xlu0 %702, %v273_v11  }
  0x51   : > { %704 = vset.pattern.permute.xlu1 %v825_v16 }
  0x52   : > { %705 = vset.pattern.permute.xlu0 %v825_v16  ;;  %429 = vperm.xlu1 %704, %v270_v10  }
  0x53   : > { %433 = vperm.xlu0 %705, %v271_v14  }
  0x56   : > { %437 = vperm.xlu1 %704, %v272_v9  }
  0x5a   : > { %441 = vperm.xlu1 %704, %v273_v11  }
  0xbf   : > { %v287_v17 = vpop.permute.xlu1 %286 }
  0xc0   : > { %v277_v20 = vpop.permute.xlu0 %276  ;;  %v300_v40 = vmul.f32 %v297_v32, %v287_v17 }
  0xc1   : > { %v298_v42 = vmul.f32 %v297_v32, %v277_v20 }
  0xc3   : > { %v292_v18 = vpop.permute.xlu1 %291 }
  0xc4   : > { %v282_v22 = vpop.permute.xlu0 %281  ;;  %v301_v36 = vmul.f32 %v297_v32, %v292_v18 }
  0xc5   : > { %v299_v37 = vmul.f32 %v297_v32, %v282_v22 }
  0xc8   : > { %v406_v19 = vpop.permute.xlu1 %405 }
  0xc9   : > { %v402_v26 = vpop.permute.xlu0 %401  ;;  %v421_v41 = vmul.f32 %v419_v34, %v406_v19 }
  0xca   : > { %v420_v52 = vmul.f32 %v419_v34, %v402_v26 }
  0xcc   : > { %v410_v21 = vpop.permute.xlu1 %409 }
  0xcd   : > { %v414_v31 = vpop.permute.xlu0 %413  ;;  %v422_v51 = vmul.f32 %v419_v34, %v410_v21 }
  0xce   : > { %v423_v45 = vmul.f32 %v419_v34, %v414_v31 }
  0xd1   : > { %v430_v25 = vpop.permute.xlu1 %429 }
  0xd2   : > { %v434_v35 = vpop.permute.xlu0 %433  ;;  %v448_v58 = vmul.f32 %v447_v38, %v430_v25 }
  0xd3   : > { %v449_v50 = vmul.f32 %v447_v38, %v434_v35 }
  0xd5   : > { %v438_v30 = vpop.permute.xlu1 %437 }
  0xd6   : > { %v450_v59 = vmul.f32 %v447_v38, %v438_v30 }
  0xd9   : > { %v442_v39 = vpop.permute.xlu1 %441 }
  0xda   : > { %v451_v55 = vmul.f32 %v447_v38, %v442_v39 }
 0x118   : > { %v615_v43 = vpop.f32.mrb[0].mxu0 }
 0x119   : > { %v618_v44 = vpop.f32.mrb[0].mxu1  ;;  %v387_v46 = vadd.f32 %v615_v43, %v299_v37  ;;  %v381_v48 = vpop.f32.mrb[1].mxu0 }
 0x11a   : > { %v397_v47 = vadd.f32 %v618_v44, %v301_v36  ;;  %v391_v49 = vpop.f32.mrb[1].mxu1  ;;  %v382_v53 = vadd.f32 %v381_v48, %v298_v42 }
 0x11b   : > { %v392_v54 = vadd.f32 %v391_v49, %v300_v40  ;;  %v425_v56 = vadd.f32 %v421_v41, %v387_v46 }
 0x11c   : > { %v427_v57 = vadd.f32 %v423_v45, %v397_v47  ;;  %v424_v60 = vadd.f32 %v420_v52, %v382_v53 }
 0x11d   : > { %v426_v61 = vadd.f32 %v422_v51, %v392_v54  ;;  %v453_v63 = vadd.f32 %v449_v50, %v425_v56 }
 0x11e   : > { %v455_v62 = vadd.f32 %v451_v55, %v427_v57  ;;  %v452_v0 = vadd.f32 %v448_v58, %v424_v60 }
 0x11f   : > { %v454_v1 = vadd.f32 %v450_v59, %v426_v61  ;;  %457 = vst [vmem:[%s253_s7 + $0x8] sm:$0xff] %v453_v63 }
 0x120   : > { %459 = vst [vmem:[%s253_s7 + $0x18] sm:$0xff] %v455_v62  ;;  %456 = vst [vmem:[%s253_s7] sm:$0xff] %v452_v0 }
 0x121   : > { %458 = vst [vmem:[%s253_s7 + $0x10] sm:$0xff] %v454_v1 }
 0x122   : > { %749 = shalt.err (!%p746_p4)
}
 0x123   : > { %s750_s13 = scalar_lea.hbm %s1017_s21, 512  ;;  %s754_s6 = scalar_lea.hbm %s1070_s4, 1024 }
 0x124   : > { %p751_p7 = scmp.ne.s32.totalorder %s1017_s21, %s750_s13  ;;  %p755_p1 = scmp.lt.u32.totalorder %s1017_s21, %s1070_s4 }
 0x125   : > { %p756_p3 = scmp.lt.u32.totalorder %s754_s6, %s750_s13  ;;  %p758_p9 = scmp.lt.u32.totalorder %s750_s13, %s1017_s21 }
 0x126   : > { %p752_p10 = pnand %p751_p7, %p1078_p11 }
 0x127   : > { %p757_p8 = por %p756_p3, %p755_p1 }
 0x128   : > { %p753_p12 = pneg %p752_p10 }
 0x129   : > { %p759_p0 = por %p758_p9, %p757_p8 }
 0x12b   : > { %p760_p6 = pnand %p759_p0, %p753_p12 }
 0x12d   : > { %763 = shalt.err (!%p760_p6)
}
 0x12e   : > { %s827_s9 = smov 128   ;;  %s828_s24 = smov 8  }
 0x12f   : > { %633 = dma.vmem_to_hbm [thread:$0]  (%p1078_p11), %s1012_s8, 512, %s1017_s21, %s461_s18, %s827_s9, %s827_s9, %s828_s24  }
 0x130 PF: > { %s490_s11 = sand.u32 1, %s798_s15   ;;  %p1079_p13 = scmp.ne.s32.totalorder %s1075_s30, 0 }
 0x131   : > { %p1080_p2 = scmp.ge.s32.totalorder %s818_s20, 2  ;;  %s491_s25 = scalar_lea.sflag [#allocation4], %s490_s11 }
 0x133   : > { %p640_p5 = pnand %p1080_p2, %p1079_p13 }
 0x135   : > { %793 = dma.done.wait (!%p640_p5), %s491_s25, 512  }
 0x136   : > { %795 = vsyncadd (!%p640_p5), %s491_s25, 4294966784  ;;  %s20_s20 = sadd.s32 1, %s818_s20   ;;  %s1081_s15 = smov %s802_s16 }
 0x137   : > { %p17_p4 = scmp.ge.s32.totalorder %s20_s20, 4   ;;  %s1082_s16 = smov %s806_s17 }
 0x138   : > { %s1083_s17 = smov %s910_s29  ;;  %s1084_s18 = smov %s814_s19 }
 0x139   : > { %s1085_s19 = smov %s1087_s23  ;;  %19 = sbr.rel (!%p17_p4) target bundleno = 6 (0x6), region = 84 }
 0x140   :  { %496 = vsyncpa [#allocation3], 1 }
 0x141   :  { %498 = vsyncpa [#allocation3 + $0x1], 1 }
 0x142   :  { %499 = vsyncpa [#allocation4], 1 }
 0x143   :  { %501 = vsyncpa [#allocation4 + $0x1], 1 }

</bundles_post_ra>
